<compile_context>
chip_gen: v7x
topology: tpu7x:2x2x1
jax: 0.10.0
libtpu: 0.0.40
codegen_flags: <defaults>
</compile_context>

<pallas_src>
import functools

import jax
import jax.numpy as jnp
from jax import lax
from jax.experimental import pallas as pl
from jax.experimental.pallas import tpu as pltpu


# Contract the feature axis of BOTH operands: (out_f, in_f) . (batch, in_f)^T
# -> (out_f, batch).  Same dimension_numbers as q @ k^T in the Pallas TPU
# flash-attention kernel, so the MXU does the batch-to-lanes relayout for us.
_NT_DIMS = (((1,), (1,)), ((), ()))


def _mlp_kernel(x_ref, w1_ref, b1_ref, w2_ref, b2_ref, w3_ref, b3_ref, o_ref,
                *, chunk):
    """x_ref: (TB, 4) input tile, batch on sublanes (straight from HBM).
    o_ref: (1, TB) lane-dense output tile (batch on lanes).

    The tile is processed `chunk` samples at a time so the live working set
    stays at a few tens of vregs even for large TB (DMA amortization and vreg
    pressure are decoupled)."""
    w1 = w1_ref[...]   # (12, 4)
    b1 = b1_ref[...]   # (12, 1)
    w2 = w2_ref[...]   # (4, 12)
    b2 = b2_ref[...]   # (4, 1)
    w3 = w3_ref[...]   # (1, 4)
    b3 = b3_ref[...]   # (1, 1)

    n_chunks = x_ref.shape[0] // chunk   # static

    def body(j, carry):
        start = pl.multiple_of(j * chunk, 128)
        xc = x_ref[pl.ds(start, chunk), :]                       # (chunk, 4)

        # layer_1: (12,4) . (chunk,4)^T -> (12, chunk), + bias, ReLU
        h1 = lax.dot_general(w1, xc, _NT_DIMS,
                             preferred_element_type=jnp.float32)
        h1 = jnp.maximum(h1 + b1, 0.0)

        # layer_2: (4,12) @ (12,chunk) -> (4, chunk), + bias, ReLU
        h2 = jnp.dot(w2, h1, preferred_element_type=jnp.float32)
        h2 = jnp.maximum(h2 + b2, 0.0)

        # Dropout(p=0.1) in eval mode == identity.

        # layer_out: (1,4) @ (4,chunk) -> (1, chunk), + bias; lane-dense store.
        out = jnp.dot(w3, h2, preferred_element_type=jnp.float32)
        o_ref[:, pl.ds(start, chunk)] = out + b3
        return carry

    lax.fori_loop(0, n_chunks, body, 0)


def binary_classification_forward(x, params, *, tb_target=16384, chunk_target=256):
    """x: (B, 4) float32.

    params: PyTorch-layout weights (out, in) and column biases (out, 1):
      w1 (12,4)  b1 (12,1)   w2 (4,12)  b2 (4,1)   w3 (1,4)  b3 (1,1)
    Returns (B, 1) float32.
    """
    B = x.shape[0]

    # Pad the batch only up to a lane multiple (128) -- never up to a TB
    # multiple.  No transpose: the kernel consumes x in its native (B, 4) form.
    B_pad = ((B + 127) // 128) * 128
    if B_pad != B:
        x = jnp.pad(x, ((0, B_pad - B), (0, 0)))

    # Batch tile per grid step, bounded by:
    #  * tb_target  -- DMA-amortization target (conservative VMEM accounting:
    #                  the (TB,4) block is assumed lane-padded to (TB,128) in
    #                  VMEM, ~512 B/row/buffer; TB=16384 => ~17.5 MiB total
    #                  double-buffered, within the 32 MiB limit set below).
    #  * B_pad      -- a block must not exceed the array.
    #  * ceil(B_pad/2) rounded to 128 -- guarantees >= 2 "parallel" grid steps
    #                  whenever B_pad >= 256, so both v7x TensorCores run.
    two_core_cap = ((B_pad + 255) // 256) * 128
    TB = max(128, min(tb_target, B_pad, two_core_cap))

    # Inner chunk size: keeps the live x working set to ~32 vregs.
    chunk = chunk_target if TB % chunk_target == 0 else 128

    num_tiles = pl.cdiv(B_pad, TB)

    const = lambda i: (0, 0)  # weights/biases: fetched once, VMEM-resident
    flops = 2 * B_pad * (4 * 12 + 12 * 4 + 4 * 1)
    bytes_accessed = B_pad * (4 + 1) * 4 + (12 * 4 + 12 + 4 * 12 + 4 + 4 + 1) * 4

    kernel = functools.partial(_mlp_kernel, chunk=chunk)

    out = pl.pallas_call(
        kernel,
        out_shape=jax.ShapeDtypeStruct((1, B_pad), jnp.float32),
        grid=(num_tiles,),
        in_specs=[
            pl.BlockSpec((TB, 4), lambda i: (i, 0)),   # x batch tile, no relayout
            pl.BlockSpec((12, 4), const),              # w1
            pl.BlockSpec((12, 1), const),              # b1
            pl.BlockSpec((4, 12), const),              # w2
            pl.BlockSpec((4, 1), const),               # b2
            pl.BlockSpec((1, 4), const),               # w3
            pl.BlockSpec((1, 1), const),               # b3
        ],
        out_specs=pl.BlockSpec((1, TB), lambda i: (0, i)),  # lane-dense output
        compiler_params=pltpu.CompilerParams(
            dimension_semantics=("parallel",),
            vmem_limit_bytes=32 * 1024 * 1024,
        ),
        cost_estimate=pl.CostEstimate(
            flops=flops, transcendentals=0, bytes_accessed=bytes_accessed
        ),
    )(
        x,
        params["w1"], params["b1"],
        params["w2"], params["b2"],
        params["w3"], params["b3"],
    )

    # (1, B_pad) -> (B, 1) via indexing only (no transpose op emitted).
    return out[0, :B, None]


def init_params(key):
    """Deterministic init mimicking PyTorch Linear default (U[-1/sqrt(fan_in), +]).

    Weights are stored PyTorch-style as (out_features, in_features); biases as
    (out_features, 1) columns so they broadcast over the lane (batch) axis."""
    def linear(key, fan_in, fan_out):
        kw, kb = jax.random.split(key)
        bound = 1.0 / jnp.sqrt(fan_in)
        w = jax.random.uniform(kw, (fan_out, fan_in), jnp.float32, -bound, bound)
        b = jax.random.uniform(kb, (fan_out, 1), jnp.float32, -bound, bound)
        return w, b

    k1, k2, k3 = jax.random.split(key, 3)
    w1, b1 = linear(k1, 4, 12)   # layer_1
    w2, b2 = linear(k2, 12, 4)   # layer_2
    w3, b3 = linear(k3, 4, 1)    # layer_out
    return {"w1": w1, "b1": b1, "w2": w2, "b2": b2, "w3": w3, "b3": b3}


def _reference_forward(x, p):
    h1 = jnp.maximum(x @ p["w1"].T + p["b1"].T, 0.0)
    h2 = jnp.maximum(h1 @ p["w2"].T + p["b2"].T, 0.0)
    return h2 @ p["w3"].T + p["b3"].T


if __name__ == "__main__":
    key = jax.random.PRNGKey(0)
    k_params, k_x = jax.random.split(key)

    params = init_params(k_params)
    x = jax.random.normal(k_x, (8, 4), dtype=jnp.float32)  # batch=8, features=4

    fwd = jax.jit(binary_classification_forward)
    out = jax.block_until_ready(fwd(x, params))

    ref = _reference_forward(x, params)
    assert out.shape == (8, 1), out.shape
    assert jnp.allclose(out, ref, atol=1e-5, rtol=1e-5), "mismatch vs reference"

    print("KERNEL_OK")
</pallas_src>

<mosaic_0001>
module attributes {stable_mosaic.version = 11 : i64} {
  func.func @_mlp_kernel(%arg0: i32, %arg1: memref<128x4xf32, #tpu.memory_space<vmem>>, %arg2: memref<12x4xf32, #tpu.memory_space<vmem>>, %arg3: memref<12x1xf32, #tpu.memory_space<vmem>>, %arg4: memref<4x12xf32, #tpu.memory_space<vmem>>, %arg5: memref<4x1xf32, #tpu.memory_space<vmem>>, %arg6: memref<1x4xf32, #tpu.memory_space<vmem>>, %arg7: memref<1x1xf32, #tpu.memory_space<vmem>>, %arg8: memref<1x128xf32, #tpu.memory_space<vmem>>) attributes {dimension_semantics = [#tpu.dimension_semantics<parallel>], iteration_bounds = array<i64: 1>, scalar_prefetch = 0 : i64, scratch_operands = 0 : i64, tpu.core_type = #tpu.core_type<tc>, window_params = [{transform_indices = @transform_0, window_bounds = array<i64: 128, 4>}, {pipeline_mode = #tpu.pipeline_mode<synchronous>, transform_indices = @transform_1, window_bounds = array<i64: 12, 4>}, {pipeline_mode = #tpu.pipeline_mode<synchronous>, transform_indices = @transform_2, window_bounds = array<i64: 12, 1>}, {pipeline_mode = #tpu.pipeline_mode<synchronous>, transform_indices = @transform_3, window_bounds = array<i64: 4, 12>}, {pipeline_mode = #tpu.pipeline_mode<synchronous>, transform_indices = @transform_4, window_bounds = array<i64: 4, 1>}, {pipeline_mode = #tpu.pipeline_mode<synchronous>, transform_indices = @transform_5, window_bounds = array<i64: 1, 4>}, {pipeline_mode = #tpu.pipeline_mode<synchronous>, transform_indices = @transform_6, window_bounds = array<i64: 1, 1>}, {transform_indices = @transform_7, window_bounds = array<i64: 1, 128>}]} {
    %c0 = arith.constant 0 : index
    %c0_0 = arith.constant 0 : index
    %0 = vector.load %arg2[%c0, %c0_0] : memref<12x4xf32, #tpu.memory_space<vmem>>, vector<12x4xf32>
    %c0_1 = arith.constant 0 : index
    %c0_2 = arith.constant 0 : index
    %1 = vector.load %arg3[%c0_1, %c0_2] : memref<12x1xf32, #tpu.memory_space<vmem>>, vector<12x1xf32>
    %c0_3 = arith.constant 0 : index
    %c0_4 = arith.constant 0 : index
    %2 = vector.load %arg4[%c0_3, %c0_4] : memref<4x12xf32, #tpu.memory_space<vmem>>, vector<4x12xf32>
    %c0_5 = arith.constant 0 : index
    %c0_6 = arith.constant 0 : index
    %3 = vector.load %arg5[%c0_5, %c0_6] : memref<4x1xf32, #tpu.memory_space<vmem>>, vector<4x1xf32>
    %c0_7 = arith.constant 0 : index
    %c0_8 = arith.constant 0 : index
    %4 = vector.load %arg6[%c0_7, %c0_8] : memref<1x4xf32, #tpu.memory_space<vmem>>, vector<1x4xf32>
    %c0_9 = arith.constant 0 : index
    %c0_10 = arith.constant 0 : index
    %5 = vector.load %arg7[%c0_9, %c0_10] : memref<1x1xf32, #tpu.memory_space<vmem>>, vector<1x1xf32>
    %c0_i32 = arith.constant 0 : i32
    %c128_i32 = arith.constant 128 : i32
    %6 = arith.muli %c0_i32, %c128_i32 : i32
    %7 = tpu.assume_multiple %6, 128 : i32
    %8 = arith.index_cast %7 : i32 to index
    %c0_11 = arith.constant 0 : index
    %9 = vector.load %arg1[%8, %c0_11] : memref<128x4xf32, #tpu.memory_space<vmem>>, vector<128x4xf32>
    %cst = arith.constant dense<0.000000e+00> : vector<12x128xf32>
    %10 = tpu.matmul %0, %9, %cst {dimension_numbers = #tpu.dot_dimension_numbers<[1], [1], [0], [0], [0, 0, 1, 0], [], []>} : vector<12x4xf32>, vector<128x4xf32>, vector<12x128xf32> -> vector<12x128xf32>
    %11 = vector.broadcast %1 : vector<12x1xf32> to vector<12x128xf32>
    %12 = arith.addf %10, %11 : vector<12x128xf32>
    %cst_12 = arith.constant 0.000000e+00 : f32
    %13 = vector.broadcast %cst_12 : f32 to vector<12x128xf32>
    %14 = arith.maximumf %12, %13 : vector<12x128xf32>
    %cst_13 = arith.constant dense<0.000000e+00> : vector<4x128xf32>
    %15 = tpu.matmul %2, %14, %cst_13 {dimension_numbers = #tpu.dot_dimension_numbers<[1], [0], [0], [1], [0, 0, 1, 1], [], []>} : vector<4x12xf32>, vector<12x128xf32>, vector<4x128xf32> -> vector<4x128xf32>
    %16 = vector.broadcast %3 : vector<4x1xf32> to vector<4x128xf32>
    %17 = arith.addf %15, %16 : vector<4x128xf32>
    %cst_14 = arith.constant 0.000000e+00 : f32
    %18 = vector.broadcast %cst_14 : f32 to vector<4x128xf32>
    %19 = arith.maximumf %17, %18 : vector<4x128xf32>
    %cst_15 = arith.constant dense<0.000000e+00> : vector<1x128xf32>
    %20 = tpu.matmul %4, %19, %cst_15 {dimension_numbers = #tpu.dot_dimension_numbers<[1], [0], [0], [1], [0, 0, 1, 1], [], []>} : vector<1x4xf32>, vector<4x128xf32>, vector<1x128xf32> -> vector<1x128xf32>
    %21 = vector.broadcast %5 : vector<1x1xf32> to vector<1x128xf32>
    %22 = arith.addf %20, %21 : vector<1x128xf32>
    %c0_16 = arith.constant 0 : index
    %23 = arith.index_cast %7 : i32 to index
    %24 = vector.load %arg8[%c0_16, %23] : memref<1x128xf32, #tpu.memory_space<vmem>>, vector<1x128xf32>
    tpu.vector_store %arg8[%c0_16, %23], %22 {strides = array<i32>} : memref<1x128xf32, #tpu.memory_space<vmem>>, vector<1x128xf32>,
    %c1_i32 = arith.constant 1 : i32
    return
  }
  func.func @transform_0(%arg0: i32) -> (i32, i32) {
    %c0_i32 = arith.constant 0 : i32
    %c0_i32_0 = arith.constant 0 : i32
    return %arg0, %c0_i32 : i32, i32
  }
  func.func @transform_1(%arg0: i32) -> (i32, i32) {
    %c0_i32 = arith.constant 0 : i32
    %c0_i32_0 = arith.constant 0 : i32
    %c0_i32_1 = arith.constant 0 : i32
    return %c0_i32, %c0_i32_0 : i32, i32
  }
  func.func @transform_2(%arg0: i32) -> (i32, i32) {
    %c0_i32 = arith.constant 0 : i32
    %c0_i32_0 = arith.constant 0 : i32
    %c0_i32_1 = arith.constant 0 : i32
    return %c0_i32, %c0_i32_0 : i32, i32
  }
  func.func @transform_3(%arg0: i32) -> (i32, i32) {
    %c0_i32 = arith.constant 0 : i32
    %c0_i32_0 = arith.constant 0 : i32
    %c0_i32_1 = arith.constant 0 : i32
    return %c0_i32, %c0_i32_0 : i32, i32
  }
  func.func @transform_4(%arg0: i32) -> (i32, i32) {
    %c0_i32 = arith.constant 0 : i32
    %c0_i32_0 = arith.constant 0 : i32
    %c0_i32_1 = arith.constant 0 : i32
    return %c0_i32, %c0_i32_0 : i32, i32
  }
  func.func @transform_5(%arg0: i32) -> (i32, i32) {
    %c0_i32 = arith.constant 0 : i32
    %c0_i32_0 = arith.constant 0 : i32
    %c0_i32_1 = arith.constant 0 : i32
    return %c0_i32, %c0_i32_0 : i32, i32
  }
  func.func @transform_6(%arg0: i32) -> (i32, i32) {
    %c0_i32 = arith.constant 0 : i32
    %c0_i32_0 = arith.constant 0 : i32
    %c0_i32_1 = arith.constant 0 : i32
    return %c0_i32, %c0_i32_0 : i32, i32
  }
  func.func @transform_7(%arg0: i32) -> (i32, i32) {
    %c0_i32 = arith.constant 0 : i32
    %c0_i32_0 = arith.constant 0 : i32
    return %c0_i32, %arg0 : i32, i32
  }
}

</mosaic_0001>

<bundles_post_ra>
// kernel: binary_classification_forward.1
= control target key start
LH: loop header
LB: loop body
LE: loop exit
PB: predicated region body
PF: predicated region fallthrough
CT: control target
= control target key end

     0   :  { %vm62_vm0 = vcmask 31744   ;;  %v519_v3 = vmov 0   ;;  %v520_v30 = vmov 0.0|0.0   ;;  %vm521_vm2 = vmmov 0   ;;  %s684_s0 = inlined_call_operand.vmem [shape: f32[128,4], index: 0, kind: input, shape index: {}]   ;;  %s685_s1 = inlined_call_operand.vmem [shape: f32[12,4], index: 1, kind: input, shape index: {}]   ;;  %s686_s2 = inlined_call_operand.vmem [shape: f32[12,1], index: 2, kind: input, shape index: {}]   ;;  %s687_s4 = inlined_call_operand.vmem [shape: f32[4,1], index: 4, kind: input, shape index: {}]   ;;  %s688_s6 = inlined_call_operand.<no memory space> [shape: f32[1,1], index: 6, kind: input, shape index: {}]   ;;  %s689_s3 = inlined_call_operand.vmem [shape: f32[4,12], index: 3, kind: input, shape index: {}]   ;;  %s690_s5 = inlined_call_operand.vmem [shape: f32[1,4], index: 5, kind: input, shape index: {}]   ;;  %s691_s7 = inlined_call_operand.vmem [shape: f32[1,128], index: 7, kind: output, shape index: {}]  }
   0x1   :  { %v36_v0 = vld [vmem:[%s684_s0] sm:$0xff]  ;;  %v37_v1 = vld [vmem:[%s684_s0 + $0x8] sm:$0xff]  ;;  %vm572_vm1 = vmpackc.low %vm62_vm0, %vm62_vm0  ;;  %517 = vset.pattern.permute.xlu0 %v519_v3  ;;  %518 = vset.pattern.permute.xlu1 %v519_v3  ;;  %v522_v31 = vmov 0.0   ;;  %v12_v33 = vstv %s688_s6  ;;  %vm203_vm3 = vcmask 1043456   ;;  %vm523_vm4 = vmmov 1  }
   0x2   :  { %v460_v4 = vpack.c.bf16 %v37_v1, %v36_v0  ;;  %v38_v5 = vld [vmem:[%s684_s0 + $0x10] sm:$0xff]  ;;  %v39_v6 = vld [vmem:[%s684_s0 + $0x18] sm:$0xff]  ;;  %v28_v8 = vld [vmem:[%s685_s1] sm:$0xff]  ;;  %508 = vmatprep.subr.bf16.mxu1 %v520_v30  ;;  %452 = vmatprep.mubr.msk.f32.mxu1 %vm521_vm2, %v522_v31  ;;  %13 = vst [vmem:[#allocation2] sm:$0x1] %v12_v33  ;;  %vm199_vm6 = vcmask 97280   ;;  %v283_v51 = vlaneseq }
   0x3   :  { %v466_v7 = vpack.c.bf16 %v39_v6, %v38_v5  ;;  %v40_v9 = vld [vmem:[%s684_s0 + $0x20] sm:$0xff]  ;;  %v41_v10 = vld [vmem:[%s684_s0 + $0x28] sm:$0xff]  ;;  %445 = vmatprep.mubr.msk.f32.mxu0 %vm62_vm0, %v28_v8  ;;  %v42_v14 = vld [vmem:[%s684_s0 + $0x30] sm:$0xff] }
   0x4   :  { %462 = vmatprep.subr.msk.bf16.mxu0 %vm572_vm1, %v460_v4  ;;  %v30_v11 = vld [vmem:[%s686_s2] sm:$0xff]  ;;  %v31_v12 = vld [vmem:[%s686_s2 + $0x8] sm:$0xf]  ;;  %v472_v13 = vpack.c.bf16 %v41_v10, %v40_v9  ;;  %v43_v15 = vld [vmem:[%s684_s0 + $0x38] sm:$0xff]  ;;  %v284_v52 = vshrl.u32 %v283_v51, 7 }
   0x5   :  { %465 = vmatpush3.bf16.xpose.msk.msra.mxu0 %vm572_vm1, %v460_v4  ;;  %54 = vperm.xlu0 %517, %v30_v11   ;;  %v478_v16 = vpack.c.bf16 %v43_v15, %v42_v14  ;;  %v44_v17 = vld [vmem:[%s684_s0 + $0x40] sm:$0xff]  ;;  %v45_v18 = vld [vmem:[%s684_s0 + $0x48] sm:$0xff]  ;;  %v46_v20 = vld [vmem:[%s684_s0 + $0x50] sm:$0xff] }
   0x6   :  { %468 = vmatprep.subr.msk.bf16.mxu0 %vm572_vm1, %v466_v7  ;;  %v484_v19 = vpack.c.bf16 %v45_v18, %v44_v17  ;;  %v47_v21 = vld [vmem:[%s684_s0 + $0x58] sm:$0xff]  ;;  %v48_v23 = vld [vmem:[%s684_s0 + $0x60] sm:$0xff]  ;;  %v49_v24 = vld [vmem:[%s684_s0 + $0x68] sm:$0xff]  ;;  %v285_v53 = vsub.s32 0, %v284_v52 }
   0x7   :  { %v490_v22 = vpack.c.bf16 %v47_v21, %v46_v20  ;;  %v496_v25 = vpack.c.bf16 %v49_v24, %v48_v23  ;;  %v50_v26 = vld [vmem:[%s684_s0 + $0x70] sm:$0xff]  ;;  %v51_v27 = vld [vmem:[%s684_s0 + $0x78] sm:$0xff]  ;;  %v29_v29 = vld [vmem:[%s685_s1 + $0x8] sm:$0xf] }
   0x8   :  { %v502_v28 = vpack.c.bf16 %v51_v27, %v50_v26  ;;  %v33_v32 = vld [vmem:[%s687_s4] sm:$0xf]  ;;  %vm510_vm5 = vmpackc.low %vm203_vm3, %vm523_vm4 }
   0x9   :  { %59 = vperm.xlu0 %517, %v31_v12   ;;  %196 = vperm.xlu1 %518, %v33_v32   ;;  %v35_v34 = vld [vmem:[#allocation2] sm:$0x1] }
   0xa   :  { %v32_v44 = vld [vmem:[%s689_s3] sm:$0xf] }
   0xb   :  { %v34_v50 = vld [vmem:[%s690_s5] sm:$0x1] }
   0xd   :  { %471 = vmatpush3.bf16.xpose.msk.msra.mxu0 %vm572_vm1, %v466_v7  ;;  %280 = vperm.xlu1 %518, %v35_v34  }
   0xe   :  { %474 = vmatprep.subr.msk.bf16.mxu0 %vm572_vm1, %v472_v13 }
  0x15   :  { %477 = vmatpush3.bf16.xpose.msk.msra.mxu0 %vm572_vm1, %v472_v13 }
  0x16   :  { %480 = vmatprep.subr.msk.bf16.mxu0 %vm572_vm1, %v478_v16 }
  0x1d   :  { %483 = vmatpush3.bf16.xpose.msk.msra.mxu0 %vm572_vm1, %v478_v16 }
  0x1e   :  { %486 = vmatprep.subr.msk.bf16.mxu0 %vm572_vm1, %v484_v19 }
  0x25   :  { %489 = vmatpush3.bf16.xpose.msk.msra.mxu0 %vm572_vm1, %v484_v19 }
  0x26   :  { %492 = vmatprep.subr.msk.bf16.mxu0 %vm572_vm1, %v490_v22 }
  0x2d   :  { %495 = vmatpush3.bf16.xpose.msk.msra.mxu0 %vm572_vm1, %v490_v22 }
  0x2e   :  { %498 = vmatprep.subr.msk.bf16.mxu0 %vm572_vm1, %v496_v25 }
  0x35   :  { %501 = vmatpush3.bf16.xpose.msk.msra.mxu0 %vm572_vm1, %v496_v25 }
  0x36   :  { %504 = vmatprep.subr.msk.bf16.mxu0 %vm572_vm1, %v502_v28 }
  0x3d   :  { %507 = vmatpush3.bf16.xpose.msk.msra.mxu0 %vm572_vm1, %v502_v28 }
  0x44   :  { %446 = vmatmul.mubr.msk.f32.vlgmr.msra.gmra.mrb[0].mxu0 %vm62_vm0, %v29_v29 }
  0x84   :  { %v55_v35 = vpop.permute.xlu0 %54 }
  0x88   :  { %v60_v36 = vpop.permute.xlu0 %59  ;;  %v197_v45 = vpop.permute.xlu1 %196 }
  0x8c   :  { %v281_v54 = vpop.permute.xlu1 %280 }
  0x8d   :  { %v286_v55 = vrot.slane %v281_v54, %v285_v53 }
 0x117   :  { %v447_v37 = vpop.f32.mrb[0].mxu0 }
 0x118   :  { %v189_v38 = vadd.f32 %v447_v37, %v60_v36  ;;  %v183_v39 = vpop.f32.mrb[1].mxu0 }
 0x119   :  { %v184_v40 = vadd.f32 %v183_v39, %v55_v35 }
 0x11a   :  { %v193_v41 = vmax.f32 %v189_v38, 0.0 }
 0x11b   :  { %v192_v42 = vmax.f32 %v184_v40, 0.0 }
 0x11d   :  { %v509_v43 = vpack.c.bf16 %v193_v41, %v192_v42 }
 0x11f   :  { %511 = vmatpush3.bf16.msk.msra.mxu1 %vm510_vm5, %v509_v43 }
 0x120   :  { %455 = vmatprep.subr.mxu1 %v522_v31 }
 0x122   :  { %453 = vmatmul.mubr.msk.f32.vlgmr.msra.gmra.mrb[0].mxu1 %vm199_vm6, %v32_v44 }
 0x123   :  { %457 = vmatprep.mubr.msk.f32.mxu1 %vm521_vm2, %v522_v31 }
 0x1f5   :  { %v273_v46 = vpop.f32.mrb[0].mxu1 }
 0x1f6   :  { %v274_v47 = vadd.f32 %v273_v46, %v197_v45  ;;  %v454_v48 = vpop.f32.mrb[1].mxu1 }
 0x1f8   :  { %v277_v49 = vmax.f32 %v274_v47, 0.0 }
 0x1fa   :  { %456 = vmatpush3.msk.msra.mxu1 %vm203_vm3, %v277_v49 }
 0x1fb   :  { %458 = vmatmul.mubr.msk.f32.vlgmr.msra.gmra.mrb[2].mxu1 %vm62_vm0, %v34_v50 }
 0x2ce   :  { %v359_v56 = vpop.f32.mrb[2].mxu1 }
 0x2cf   :  { %v360_v57 = vadd.f32 %v359_v56, %v286_v55  ;;  %v459_v58 = vpop.f32.mrb[3].mxu1 }
 0x2d1   :  { %363 = vst [vmem:[%s691_s7] sm:$0x1] %v360_v57 }

</bundles_post_ra>
